<compile_context>
chip_gen: v7x
topology: tpu7x:2x2x1
jax: 0.10.0
libtpu: 0.0.40
codegen_flags: <defaults>
</compile_context>

<pallas_src>
import math

import jax
import jax.numpy as jnp
from jax.experimental import pallas as pl
from jax.experimental.pallas import tpu as pltpu


def _rsoftmax_kernel(x_ref, o_ref):
    # x_ref: (TB, G, R, 1, P) ; o_ref: (TB, R, G, 1, P). Softmax over radix R.
    x = x_ref[...].astype(jnp.float32)
    m = jnp.max(x, axis=2, keepdims=True)
    e = jnp.exp(x - m)
    s = jnp.sum(e, axis=2, keepdims=True)
    p = e / s  # exact divide: rows must sum to 1 (review correctness note)
    # (G, R) -> (R, G): both are leading (untiled) dims of the block, so this
    # transpose is free vreg re-indexing — no data movement.
    o_ref[...] = jnp.transpose(p, (0, 2, 1, 3, 4)).astype(o_ref.dtype)


def _sigmoid_kernel(x_ref, o_ref):
    x = x_ref[...].astype(jnp.float32)
    # Single-transcendental sigmoid: one EUP tanh instead of exp + reciprocal.
    o_ref[...] = (0.5 * jnp.tanh(0.5 * x) + 0.5).astype(o_ref.dtype)


def rsoftmax(x, radix, cardinality):
    """Exact forward of rSoftMax. x: (batch, C, H, W) NCHW."""
    batch = x.shape[0]
    feat = math.prod(x.shape[1:])
    itemsize = jnp.dtype(x.dtype).itemsize

    if radix > 1:
        G, R = cardinality, radix
        assert feat % (G * R) == 0, "C*H*W must be divisible by radix*cardinality"
        P = feat // (G * R)
        # Free contiguous view. The singleton axis before P makes (1, P) the
        # tiled dims, so G and R stay leading and the in-kernel transpose is
        # trivially lowerable.
        x5 = x.reshape(batch, G, R, 1, P)

        # ~2 MiB per input block; with in+out double-buffering this stays well
        # inside the scoped-VMEM limit set below on every generation.
        row_bytes = feat * itemsize
        TB = max(1, min(batch, (2 << 20) // max(1, row_bytes)))
        steps = pl.cdiv(batch, TB)

        out = pl.pallas_call(
            _rsoftmax_kernel,
            out_shape=jax.ShapeDtypeStruct((batch, R, G, 1, P), x.dtype),
            grid=(steps,),
            in_specs=[pl.BlockSpec((TB, G, R, 1, P), lambda b: (b, 0, 0, 0, 0))],
            out_specs=pl.BlockSpec((TB, R, G, 1, P), lambda b: (b, 0, 0, 0, 0)),
            compiler_params=pltpu.CompilerParams(
                # Only ask for megacore sharding when there is >1 real step.
                dimension_semantics=(("parallel",) if steps > 1 else ("arbitrary",)),
                vmem_limit_bytes=32 * 1024 * 1024,
            ),
        )(x5)
        # Contiguous flatten — matches torch's `.reshape(batch, -1)` of the
        # (B, R, G, P) transposed tensor.
        return out.reshape(batch, -1)
    else:
        xf = x.reshape(batch, feat)
        # Lane-dense feature tiles: full row if small, else a multiple of 128.
        TF = feat if feat <= 4096 else 2048
        # Batch tile: full batch if small, else a multiple of 8 (8,128 rule).
        TB = batch if batch <= 8 else 8 * max(1, min(batch // 8, 16))
        grid = (pl.cdiv(batch, TB), pl.cdiv(feat, TF))
        out = pl.pallas_call(
            _sigmoid_kernel,
            out_shape=jax.ShapeDtypeStruct((batch, feat), x.dtype),
            grid=grid,
            in_specs=[pl.BlockSpec((TB, TF), lambda i, j: (i, j))],
            out_specs=pl.BlockSpec((TB, TF), lambda i, j: (i, j)),
            compiler_params=pltpu.CompilerParams(
                dimension_semantics=("parallel", "parallel"),
                vmem_limit_bytes=32 * 1024 * 1024,
            ),
        )(xf)
        # PyTorch sigmoid branch keeps the original (B, C, H, W) shape.
        return out.reshape(x.shape)


def _ref_rsoftmax(x, radix, cardinality):
    batch = x.shape[0]
    if radix > 1:
        xr = x.reshape(batch, cardinality, radix, -1)
        xr = jnp.transpose(xr, (0, 2, 1, 3))
        xr = jax.nn.softmax(xr.astype(jnp.float32), axis=1).astype(x.dtype)
        return xr.reshape(batch, -1)
    return jax.nn.sigmoid(x.astype(jnp.float32)).astype(x.dtype)


if __name__ == "__main__":
    key = jax.random.PRNGKey(0)
    k1, k2, k3 = jax.random.split(key, 3)

    # Exact math in-kernel now, so a tight tolerance is fine.
    TOL = 1e-4

    # 1) radix > 1: SplAtConv2d-style post-GAP attention (B, radix*channels, 1, 1)
    radix, cardinality, c_per = 2, 4, 16
    B = 2
    C = radix * cardinality * c_per            # 128
    x = jax.random.normal(k1, (B, C, 1, 1), dtype=jnp.float32)
    y = jax.block_until_ready(rsoftmax(x, radix, cardinality))
    y_ref = _ref_rsoftmax(x, radix, cardinality)
    assert y.shape == (B, C)
    assert jnp.allclose(y, y_ref, atol=TOL, rtol=TOL), float(jnp.max(jnp.abs(y - y_ref)))

    # 2) radix > 1 with spatial extent (generality check)
    x2 = jax.random.normal(k2, (2, 16, 4, 4), dtype=jnp.float32)
    y2 = jax.block_until_ready(rsoftmax(x2, 2, 2))
    y2_ref = _ref_rsoftmax(x2, 2, 2)
    assert y2.shape == (2, 16 * 4 * 4)
    assert jnp.allclose(y2, y2_ref, atol=TOL, rtol=TOL), float(jnp.max(jnp.abs(y2 - y2_ref)))

    # 3) radix == 1: sigmoid branch, keeps original NCHW shape
    x3 = jax.random.normal(k3, (B, 64, 1, 1), dtype=jnp.float32)
    y3 = jax.block_until_ready(rsoftmax(x3, 1, cardinality))
    y3_ref = _ref_rsoftmax(x3, 1, cardinality)
    assert y3.shape == x3.shape
    assert jnp.allclose(y3, y3_ref, atol=TOL, rtol=TOL), float(jnp.max(jnp.abs(y3 - y3_ref)))

    print("KERNEL_OK")
</pallas_src>

<mosaic_0001>
module attributes {stable_mosaic.version = 11 : i64} {
  func.func @_rsoftmax_kernel(%arg0: i32, %arg1: memref<2x4x2x1x16xf32, #tpu.memory_space<vmem>>, %arg2: memref<2x2x4x1x16xf32, #tpu.memory_space<vmem>>) attributes {dimension_semantics = [#tpu.dimension_semantics<arbitrary>], iteration_bounds = array<i64: 1>, scalar_prefetch = 0 : i64, scratch_operands = 0 : i64, tpu.core_type = #tpu.core_type<tc>, window_params = [{transform_indices = @transform_0, window_bounds = array<i64: 2, 4, 2, 1, 16>}, {transform_indices = @transform_1, window_bounds = array<i64: 2, 2, 4, 1, 16>}]} {
    %c0 = arith.constant 0 : index
    %c0_0 = arith.constant 0 : index
    %c0_1 = arith.constant 0 : index
    %c0_2 = arith.constant 0 : index
    %c0_3 = arith.constant 0 : index
    %0 = vector.load %arg1[%c0, %c0_0, %c0_1, %c0_2, %c0_3] : memref<2x4x2x1x16xf32, #tpu.memory_space<vmem>>, vector<2x4x2x1x16xf32>
    %cst = arith.constant dense<0xFF800000> : vector<2x4x1x16xf32>
    %1 = vector.multi_reduction <maximumf>, %0, %cst [2] : vector<2x4x2x1x16xf32> to vector<2x4x1x16xf32>
    %2 = vector.shape_cast %1 : vector<2x4x1x16xf32> to vector<2x4x1x1x16xf32>
    %3 = vector.broadcast %2 : vector<2x4x1x1x16xf32> to vector<2x4x2x1x16xf32>
    %4 = arith.subf %0, %3 : vector<2x4x2x1x16xf32>
    %5 = math.exp %4 : vector<2x4x2x1x16xf32>
    %cst_4 = arith.constant dense<0.000000e+00> : vector<2x4x1x16xf32>
    %6 = vector.multi_reduction <add>, %5, %cst_4 [2] : vector<2x4x2x1x16xf32> to vector<2x4x1x16xf32>
    %7 = vector.shape_cast %6 : vector<2x4x1x16xf32> to vector<2x4x1x1x16xf32>
    %8 = vector.broadcast %7 : vector<2x4x1x1x16xf32> to vector<2x4x2x1x16xf32>
    %9 = arith.divf %5, %8 : vector<2x4x2x1x16xf32>
    %10 = tpu.transpose %9, [0, 2, 1, 3, 4] : vector<2x4x2x1x16xf32> -> vector<2x2x4x1x16xf32>
    %c0_5 = arith.constant 0 : index
    %c0_6 = arith.constant 0 : index
    %c0_7 = arith.constant 0 : index
    %c0_8 = arith.constant 0 : index
    %c0_9 = arith.constant 0 : index
    %11 = vector.load %arg2[%c0_5, %c0_6, %c0_7, %c0_8, %c0_9] : memref<2x2x4x1x16xf32, #tpu.memory_space<vmem>>, vector<2x2x4x1x16xf32>
    tpu.vector_store %arg2[%c0_5, %c0_6, %c0_7, %c0_8, %c0_9], %10 {strides = array<i32>} : memref<2x2x4x1x16xf32, #tpu.memory_space<vmem>>, vector<2x2x4x1x16xf32>,
    return
  }
  func.func @transform_0(%arg0: i32) -> (i32, i32, i32, i32, i32) {
    %c0_i32 = arith.constant 0 : i32
    %c0_i32_0 = arith.constant 0 : i32
    %c0_i32_1 = arith.constant 0 : i32
    %c0_i32_2 = arith.constant 0 : i32
    %c0_i32_3 = arith.constant 0 : i32
    return %arg0, %c0_i32, %c0_i32_0, %c0_i32_1, %c0_i32_2 : i32, i32, i32, i32, i32
  }
  func.func @transform_1(%arg0: i32) -> (i32, i32, i32, i32, i32) {
    %c0_i32 = arith.constant 0 : i32
    %c0_i32_0 = arith.constant 0 : i32
    %c0_i32_1 = arith.constant 0 : i32
    %c0_i32_2 = arith.constant 0 : i32
    %c0_i32_3 = arith.constant 0 : i32
    return %arg0, %c0_i32, %c0_i32_0, %c0_i32_1, %c0_i32_2 : i32, i32, i32, i32, i32
  }
}

</mosaic_0001>

<bundles_post_ra>
// kernel: tpu_custom_call.1
= control target key start
LH: loop header
LB: loop body
LE: loop exit
PB: predicated region body
PF: predicated region fallthrough
CT: control target
= control target key end

     0   :  { %6 = vsyncpa [#allocation3], 0  ;;  %s409_s0 = inlined_call_operand.hbm [shape: f32[2,4,2,1,16], index: 0, kind: input, shape index: {}]   ;;  %s410_s1 = inlined_call_operand.hbm [shape: f32[2,2,4,1,16], index: 1, kind: output, shape index: {}]  }
   0x1   :  { %7 = vsyncpa [#allocation4], 0  ;;  %s297_s6 = smov [#allocation2]   ;;  %s249_s10 = scalar_lea.hbm %s409_s0, 256 }
   0x2   :  { %s13_s7 = sshll.u32 %s297_s6, 4  ;;  %p250_p0 = scmp.ne.s32.totalorder %s409_s0, %s249_s10  ;;  %s14_s7 = int_to_ptr.vmem [resolvable:$true] %s13_s7 }
   0x3   :  { %p253_p1 = scmp.lt.u32.totalorder %s249_s10, %s409_s0 }
   0x5   :  { %p255_p2 = pnand %p253_p1, %p250_p0 }
   0x7   :  { %258 = shalt.err (!%p255_p2)
}
   0x8   :  { %s259_s15 = scalar_lea.vmem %s14_s7, 256  ;;  %p264_p4 = scmp.lt.s32.totalorder %s14_s7, %s14_s7 }
   0x9   :  { %p260_p3 = scmp.ne.s32.totalorder %s14_s7, %s259_s15  ;;  %p265_p5 = scmp.lt.s32.totalorder %s259_s15, %s259_s15 }
   0xb   :  { %p266_p6 = por %p265_p5, %p264_p4 }
   0xd   :  { %p267_p7 = pnand %p266_p6, %p260_p3 }
   0xf   :  { %270 = shalt.err (!%p267_p7)
}
  0x10   :  { %s298_s16 = smov 16   ;;  %s299_s17 = smov 1  }
  0x11   :  { %19 = dma.hbm_to_vmem [thread:$0]  %s409_s0, 256, %s14_s7, [#allocation3], %s298_s16, %s298_s16, %s299_s17  }
  0x12   :  { %293 = dma.done.wait [#allocation3], 256  }
  0x13   :  { %294 = vsyncadd [#allocation3], 4294967040  ;;  %v39_v0 = vlaneseq  ;;  %v23_v2 = vld [vmem:[#allocation2] sm:$0x1]  ;;  %v24_v3 = vld [vmem:[#allocation2 + $0x1] sm:$0x1] }
  0x14   :  { %v25_v4 = vld [vmem:[#allocation2 + $0x2] sm:$0x1]  ;;  %v26_v7 = vld [vmem:[#allocation2 + $0x3] sm:$0x1]  ;;  %v27_v11 = vld [vmem:[#allocation2 + $0x4] sm:$0x1] }
  0x15   :  { %vm326_vm0 = vcmp.lt.s32.totalorder %v39_v0, 16  ;;  %v28_v12 = vld [vmem:[#allocation2 + $0x5] sm:$0x1]  ;;  %v29_v16 = vld [vmem:[#allocation2 + $0x6] sm:$0x1]  ;;  %vm115_vm1 = vcmask 122880  }
  0x16   :  { %v43_v5 = vsel %vm326_vm0, %v23_v2, -inf  ;;  %v44_v6 = vsel %vm326_vm0, %v24_v3, -inf  ;;  %v46_v8 = vsel %vm326_vm0, %v25_v4, -inf  ;;  %v47_v10 = vsel %vm326_vm0, %v26_v7, -inf  ;;  %v30_v17 = vld [vmem:[#allocation2 + $0x7] sm:$0x1] }
  0x17   :  { %v45_v9 = vmax.f32 %v43_v5, %v44_v6  ;;  %v48_v13 = vmax.f32 %v46_v8, %v47_v10  ;;  %v49_v14 = vsel %vm326_vm0, %v27_v11, -inf  ;;  %v50_v15 = vsel %vm326_vm0, %v28_v12, -inf  ;;  %v31_v22 = vld [vmem:[#allocation2 + $0x8] sm:$0x1]  ;;  %v32_v23 = vld [vmem:[#allocation2 + $0x9] sm:$0x1] }
  0x18   :  { %v51_v20 = vmax.f32 %v49_v14, %v50_v15  ;;  %v52_v21 = vsel %vm326_vm0, %v29_v16, -inf  ;;  %v53_v26 = vsel %vm326_vm0, %v30_v17, -inf  ;;  %v55_v27 = vsel %vm326_vm0, %v31_v22, -inf  ;;  %v33_v28 = vld [vmem:[#allocation2 + $0xa] sm:$0x1]  ;;  %s300_s0 = smov [#allocation5]  }
  0x19   :  { %v67_v18 = vsub.f32 %v23_v2, %v45_v9  ;;  %v68_v19 = vsub.f32 %v24_v3, %v45_v9  ;;  %v69_v24 = vsub.f32 %v25_v4, %v48_v13  ;;  %v70_v25 = vsub.f32 %v26_v7, %v48_v13  ;;  %v34_v33 = vld [vmem:[#allocation2 + $0xb] sm:$0x1]  ;;  %v35_v44 = vld [vmem:[#allocation2 + $0xc] sm:$0x1]  ;;  %v36_v48 = vld [vmem:[#allocation2 + $0xd] sm:$0x1] }
  0x1a   :  { %v71_v31 = vsub.f32 %v27_v11, %v51_v20  ;;  %v72_v32 = vsub.f32 %v28_v12, %v51_v20  ;;  %v54_v36 = vmax.f32 %v52_v21, %v53_v26  ;;  %v56_v37 = vsel %vm326_vm0, %v32_v23, -inf  ;;  %v37_v49 = vld [vmem:[#allocation2 + $0xe] sm:$0x1]  ;;  %v38_v53 = vld [vmem:[#allocation2 + $0xf] sm:$0x1]  ;;  %s185_s20 = sshll.u32 %s300_s0, 4  ;;  %s186_s20 = int_to_ptr.vmem [resolvable:$true] %s185_s20 }
  0x1b   :  { %v83_v29 = vmul.f32 1.442695, %v67_v18  ;;  %v85_v30 = vmul.f32 1.442695, %v68_v19  ;;  %v87_v34 = vmul.f32 1.442695, %v69_v24  ;;  %v57_v40 = vmax.f32 %v55_v27, %v56_v37  ;;  %p276_p9 = scmp.lt.s32.totalorder %s186_s20, %s186_s20 }
  0x1c   :  { %v89_v35 = vmul.f32 1.442695, %v70_v25  ;;  %v91_v38 = vmul.f32 1.442695, %v71_v31  ;;  %v93_v39 = vmul.f32 1.442695, %v72_v32  ;;  %v73_v41 = vsub.f32 %v29_v16, %v54_v36 }
  0x1d   :  { %201 = vpow2.f32 %v83_v29  ;;  %v74_v42 = vsub.f32 %v30_v17, %v54_v36  ;;  %v58_v43 = vsel %vm326_vm0, %v33_v28, -inf  ;;  %v75_v45 = vsub.f32 %v31_v22, %v57_v40  ;;  %s271_s21 = scalar_lea.vmem %s186_s20, 256 }
  0x1e   :  { %203 = vpow2.f32 %v85_v30  ;;  %v76_v46 = vsub.f32 %v32_v23, %v57_v40  ;;  %v59_v47 = vsel %vm326_vm0, %v34_v33, -inf  ;;  %v95_v50 = vmul.f32 1.442695, %v73_v41  ;;  %p272_p8 = scmp.ne.s32.totalorder %s186_s20, %s271_s21  ;;  %p277_p10 = scmp.lt.s32.totalorder %s271_s21, %s271_s21 }
  0x1f   :  { %205 = vpow2.f32 %v87_v34  ;;  %v97_v51 = vmul.f32 1.442695, %v74_v42  ;;  %v60_v52 = vmax.f32 %v58_v43, %v59_v47  ;;  %v99_v54 = vmul.f32 1.442695, %v75_v45 }
  0x20   :  { %207 = vpow2.f32 %v89_v35  ;;  %v101_v55 = vmul.f32 1.442695, %v76_v46  ;;  %v61_v56 = vsel %vm326_vm0, %v35_v44, -inf  ;;  %v62_v59 = vsel %vm326_vm0, %v36_v48, -inf  ;;  %p278_p11 = por %p277_p10, %p276_p9 }
  0x21   :  { %209 = vpow2.f32 %v91_v38  ;;  %v77_v57 = vsub.f32 %v33_v28, %v60_v52  ;;  %v78_v58 = vsub.f32 %v34_v33, %v60_v52  ;;  %v63_v60 = vmax.f32 %v61_v56, %v62_v59 }
  0x22   :  { %211 = vpow2.f32 %v93_v39  ;;  %v64_v61 = vsel %vm326_vm0, %v37_v49, -inf  ;;  %v65_v62 = vsel %vm326_vm0, %v38_v53, -inf  ;;  %p279_p12 = pnand %p278_p11, %p272_p8 }
  0x23   :  { %213 = vpow2.f32 %v95_v50  ;;  %v103_v63 = vmul.f32 1.442695, %v77_v57  ;;  %v105_v0 = vmul.f32 1.442695, %v78_v58  ;;  %v66_v2 = vmax.f32 %v64_v61, %v65_v62 }
  0x24   :  { %215 = vpow2.f32 %v97_v51  ;;  %v79_v3 = vsub.f32 %v35_v44, %v63_v60  ;;  %v80_v4 = vsub.f32 %v36_v48, %v63_v60 }
  0x25   :  { %217 = vpow2.f32 %v99_v54  ;;  %v81_v5 = vsub.f32 %v37_v49, %v66_v2  ;;  %v82_v6 = vsub.f32 %v38_v53, %v66_v2 }
  0x26   :  { %219 = vpow2.f32 %v101_v55  ;;  %v107_v8 = vmul.f32 1.442695, %v79_v3  ;;  %v109_v9 = vmul.f32 1.442695, %v80_v4 }
  0x27   :  { %v202_v7 = vpop.eup %201  ;;  %221 = vpow2.f32 %v103_v63  ;;  %v111_v1 = vmul.f32 1.442695, %v81_v5  ;;  %v113_v14 = vmul.f32 1.442695, %v82_v6 }
  0x28   :  { %v204_v10 = vpop.eup %203  ;;  %v116_v11 = vsel %vm115_vm1, %v202_v7, 0.0  ;;  %223 = vpow2.f32 %v105_v0 }
  0x29   :  { %v206_v12 = vpop.eup %205  ;;  %v117_v13 = vsel %vm115_vm1, %v204_v10, 0.0  ;;  %225 = vpow2.f32 %v107_v8 }
  0x2a   :  { %v208_v15 = vpop.eup %207  ;;  %v118_v16 = vadd.f32 %v117_v13, %v116_v11  ;;  %v119_v17 = vsel %vm115_vm1, %v206_v12, 0.0  ;;  %227 = vpow2.f32 %v109_v9 }
  0x2b   :  { %v210_v18 = vpop.eup %209  ;;  %v120_v19 = vsel %vm115_vm1, %v208_v15, 0.0  ;;  %229 = vpow2.f32 %v111_v1 }
  0x2c   :  { %v212_v20 = vpop.eup %211  ;;  %231 = vrcp.f32 %v118_v16  ;;  %v121_v21 = vadd.f32 %v120_v19, %v119_v17  ;;  %v122_v22 = vsel %vm115_vm1, %v210_v18, 0.0 }
  0x2d   :  { %v214_v23 = vpop.eup %213  ;;  %v123_v24 = vsel %vm115_vm1, %v212_v20, 0.0  ;;  %233 = vpow2.f32 %v113_v14 }
  0x2e   :  { %v216_v25 = vpop.eup %215  ;;  %235 = vrcp.f32 %v121_v21  ;;  %v124_v26 = vadd.f32 %v123_v24, %v122_v22  ;;  %v125_v27 = vsel %vm115_vm1, %v214_v23, 0.0 }
  0x2f   :  { %v218_v28 = vpop.eup %217  ;;  %v126_v29 = vsel %vm115_vm1, %v216_v25, 0.0 }
  0x30   :  { %v220_v30 = vpop.eup %219  ;;  %237 = vrcp.f32 %v124_v26  ;;  %v127_v31 = vadd.f32 %v126_v29, %v125_v27  ;;  %v128_v32 = vsel %vm115_vm1, %v218_v28, 0.0 }
  0x31   :  { %v222_v33 = vpop.eup %221  ;;  %v129_v34 = vsel %vm115_vm1, %v220_v30, 0.0 }
  0x32   :  { %v224_v35 = vpop.eup %223  ;;  %239 = vrcp.f32 %v127_v31  ;;  %v130_v36 = vadd.f32 %v129_v34, %v128_v32  ;;  %v131_v37 = vsel %vm115_vm1, %v222_v33, 0.0 }
  0x33   :  { %v226_v38 = vpop.eup %225  ;;  %v132_v39 = vsel %vm115_vm1, %v224_v35, 0.0 }
  0x34   :  { %v228_v40 = vpop.eup %227  ;;  %241 = vrcp.f32 %v130_v36  ;;  %v133_v41 = vadd.f32 %v132_v39, %v131_v37  ;;  %v134_v42 = vsel %vm115_vm1, %v226_v38, 0.0 }
  0x35   :  { %v230_v43 = vpop.eup %229  ;;  %v135_v44 = vsel %vm115_vm1, %v228_v40, 0.0 }
  0x36   :  { %v232_v45 = vpop.eup %231  ;;  %243 = vrcp.f32 %v133_v41  ;;  %v136_v46 = vadd.f32 %v135_v44, %v134_v42  ;;  %v137_v47 = vsel %vm115_vm1, %v230_v43, 0.0 }
  0x37   :  { %v234_v48 = vpop.eup %233  ;;  %v141_v49 = vmul.f32 %v232_v45, %v202_v7  ;;  %v142_v50 = vmul.f32 %v232_v45, %v204_v10 }
  0x38   :  { %v236_v51 = vpop.eup %235  ;;  %245 = vrcp.f32 %v136_v46  ;;  %v138_v52 = vsel %vm115_vm1, %v234_v48, 0.0 }
  0x39   :  { %164 = vst.msk [vmem:[#allocation5] sm:$0x1] %vm115_vm1, %v141_v49  ;;  %v144_v53 = vmul.f32 %v236_v51, %v206_v12  ;;  %168 = vst.msk [vmem:[#allocation5 + $0x4] sm:$0x1] %vm115_vm1, %v142_v50  ;;  %v145_v54 = vmul.f32 %v236_v51, %v208_v15  ;;  %v139_v55 = vadd.f32 %v138_v52, %v137_v47 }
  0x3a   :  { %v238_v56 = vpop.eup %237 }
  0x3b   :  { %165 = vst.msk [vmem:[#allocation5 + $0x1] sm:$0x1] %vm115_vm1, %v144_v53  ;;  %v147_v57 = vmul.f32 %v238_v56, %v210_v18  ;;  %169 = vst.msk [vmem:[#allocation5 + $0x5] sm:$0x1] %vm115_vm1, %v145_v54  ;;  %v148_v58 = vmul.f32 %v238_v56, %v212_v20  ;;  %247 = vrcp.f32 %v139_v55 }
  0x3c   :  { %v240_v59 = vpop.eup %239 }
  0x3d   :  { %166 = vst.msk [vmem:[#allocation5 + $0x2] sm:$0x1] %vm115_vm1, %v147_v57  ;;  %v150_v60 = vmul.f32 %v240_v59, %v214_v23  ;;  %170 = vst.msk [vmem:[#allocation5 + $0x6] sm:$0x1] %vm115_vm1, %v148_v58  ;;  %v151_v61 = vmul.f32 %v240_v59, %v216_v25 }
  0x3e   :  { %v242_v62 = vpop.eup %241 }
  0x3f   :  { %167 = vst.msk [vmem:[#allocation5 + $0x3] sm:$0x1] %vm115_vm1, %v150_v60  ;;  %171 = vst.msk [vmem:[#allocation5 + $0x7] sm:$0x1] %vm115_vm1, %v151_v61  ;;  %v153_v63 = vmul.f32 %v242_v62, %v218_v28  ;;  %v154_v0 = vmul.f32 %v242_v62, %v220_v30 }
  0x40   :  { %v244_v2 = vpop.eup %243 }
  0x41   :  { %172 = vst.msk [vmem:[#allocation5 + $0x8] sm:$0x1] %vm115_vm1, %v153_v63  ;;  %v156_v3 = vmul.f32 %v244_v2, %v222_v33  ;;  %176 = vst.msk [vmem:[#allocation5 + $0xc] sm:$0x1] %vm115_vm1, %v154_v0  ;;  %v157_v4 = vmul.f32 %v244_v2, %v224_v35 }
  0x42   :  { %v246_v5 = vpop.eup %245 }
  0x43   :  { %173 = vst.msk [vmem:[#allocation5 + $0x9] sm:$0x1] %vm115_vm1, %v156_v3  ;;  %v159_v6 = vmul.f32 %v246_v5, %v226_v38  ;;  %177 = vst.msk [vmem:[#allocation5 + $0xd] sm:$0x1] %vm115_vm1, %v157_v4  ;;  %v160_v7 = vmul.f32 %v246_v5, %v228_v40 }
  0x45   :  { %v248_v8 = vpop.eup %247  ;;  %174 = vst.msk [vmem:[#allocation5 + $0xa] sm:$0x1] %vm115_vm1, %v159_v6  ;;  %178 = vst.msk [vmem:[#allocation5 + $0xe] sm:$0x1] %vm115_vm1, %v160_v7 }
  0x46   :  { %v162_v9 = vmul.f32 %v248_v8, %v230_v43  ;;  %v163_v10 = vmul.f32 %v248_v8, %v234_v48 }
  0x48   :  { %175 = vst.msk [vmem:[#allocation5 + $0xb] sm:$0x1] %vm115_vm1, %v162_v9  ;;  %179 = vst.msk [vmem:[#allocation5 + $0xf] sm:$0x1] %vm115_vm1, %v163_v10 }
  0x49   :  { %282 = shalt.err (!%p279_p12)
}
  0x4a   :  { %s283_s24 = scalar_lea.hbm %s410_s1, 256 }
  0x4b   :  { %p284_p13 = scmp.ne.s32.totalorder %s410_s1, %s283_s24  ;;  %p287_p0 = scmp.lt.u32.totalorder %s283_s24, %s410_s1 }
  0x4d   :  { %p289_p1 = pnand %p287_p0, %p284_p13 }
  0x4f   :  { %292 = shalt.err (!%p289_p1)
}
  0x50   :  { %191 = dma.vmem_to_hbm [thread:$0]  %s186_s20, 256, %s410_s1, [#allocation4], %s298_s16, %s298_s16, %s299_s17  }
  0x51   :  { %295 = dma.done.wait [#allocation4], 256  }
  0x52   :  { %296 = vsyncadd [#allocation4], 4294967040 }
  0x53   :  { %195 = vsyncpa [#allocation3], 1 }
  0x54   :  { %196 = vsyncpa [#allocation4], 1 }

</bundles_post_ra>
